<compile_context>
chip_gen: v7x
topology: tpu7x:2x2x1
jax: 0.10.0
libtpu: 0.0.40
codegen_flags: <defaults>
</compile_context>

<pallas_src>
import jax
import jax.numpy as jnp
import numpy as np
from jax import lax
from jax.experimental import pallas as pl
from jax.experimental.pallas import tpu as pltpu


def _round_up(x, m):
    return (x + m - 1) // m * m


def _cdiv(a, b):
    return (a + b - 1) // b


def _global_sa_kernel(lo_ref, hi_ref, x_ref, pos_ref, bid_ref,
                      w1x_ref, w1p_ref, b1_ref, w2_ref, b2_ref, out_ref):
    """One grid step = one (core, point-block) pair.

    lo_ref/hi_ref : (ncores, bpc) int32 in SMEM (scalar prefetch) — per-block
                    inclusive graph-id range present in that point block.
    x_ref         : (TM, C)     point features (compute dtype)
    pos_ref       : (TM, 3)     point coordinates (compute dtype)
    bid_ref       : (TM, 1)     int32 graph id (-1 for padding rows)
    w1x/w1p/b1, w2/b2 : lane-padded MLP parameters (resident every step)
    out_ref       : (B_pad, H2_pad) per-core segment-max accumulator
                    (same block across the reduction axis -> VMEM resident)
    """
    c = pl.program_id(0)          # core / outer parallel axis
    i = pl.program_id(1)          # point-block / reduction axis

    @pl.when(i == 0)
    def _init():
        out_ref[...] = jnp.full(out_ref.shape, -jnp.inf, dtype=out_ref.dtype)

    # ---- per-point MLP (MXU); concat([x, pos]) @ w1 == x @ w1_x + pos @ w1_pos ----
    h = jnp.dot(x_ref[...], w1x_ref[...], preferred_element_type=jnp.float32)
    h = h + jnp.dot(pos_ref[...], w1p_ref[...], preferred_element_type=jnp.float32)
    h = jnp.maximum(h + b1_ref[...], 0.0)                       # f32 elementwise
    h = jnp.dot(h.astype(w2_ref.dtype), w2_ref[...],
                preferred_element_type=jnp.float32)
    h = jnp.maximum(h + b2_ref[...], 0.0)                       # (TM, H2_pad) f32

    bid = bid_ref[...]                                          # (TM, 1) int32
    nb, _ = out_ref.shape
    row_ids = lax.broadcasted_iota(jnp.int32, (nb, 1), 0)       # (B_pad, 1)

    lo = lo_ref[c, i]
    hi = hi_ref[c, i]

    # Bounded segmented max: only graphs actually present in this block.
    # Padding rows carry bid == -1 so they never match; graphs outside
    # [0, B_pad) never match row_ids and are silently dropped.
    def body(b, acc):
        masked = jnp.where(bid == b, h, -jnp.inf)               # (TM, H2_pad)
        blk_max = jnp.max(masked, axis=0, keepdims=True)        # (1, H2_pad)
        upd = jnp.where(row_ids == b, blk_max, -jnp.inf)        # (B_pad, H2_pad)
        return jnp.maximum(acc, upd)

    out_ref[...] = lax.fori_loop(lo, hi + 1, body, out_ref[...])


def global_sa_module(x, pos, batch, w1, b1, w2, b2, *, num_graphs,
                     tm=1024, num_cores=2, compute_dtype=jnp.bfloat16):
    """Pallas implementation of GlobalSAModule.forward.

    Returns (pooled_features [B, H2], zeros [B, 3], arange(B)).
    compute_dtype: dtype of the MXU operands (bf16 on v6e/v7x; f32 also works,
    e.g. if strict numerics are required). Accumulation / elementwise math stays f32.
    """
    n, c = x.shape
    assert pos.shape == (n, 3)
    cin = c + 3
    h1 = w1.shape[1]
    h2 = w2.shape[1]
    assert w1.shape == (cin, h1) and w2.shape == (h1, h2)

    # ---------------- tiling ----------------
    tm = max(8, min(int(tm), _round_up(n, 8)))
    tm = _round_up(tm, 8)
    n_blocks = _cdiv(n, tm)
    ncores = max(1, min(int(num_cores), n_blocks))
    bpc = _cdiv(n_blocks, ncores)               # blocks per core
    n_blocks = ncores * bpc
    n_pad = n_blocks * tm

    # Lane-dense padding: hidden dims -> multiple of 128, graphs -> multiple of 8.
    h1p = _round_up(h1, 128)
    h2p = _round_up(h2, 128)
    bpad = max(8, _round_up(num_graphs, 8))

    # ---------------- parameters (split w1, pad to lane width) ----------------
    w1x = jnp.zeros((c, h1p), compute_dtype).at[:, :h1].set(w1[:c].astype(compute_dtype))
    w1p = jnp.zeros((3, h1p), compute_dtype).at[:, :h1].set(w1[c:].astype(compute_dtype))
    b1p = jnp.zeros((1, h1p), jnp.float32).at[:, :h1].set(
        b1.astype(jnp.float32).reshape(1, h1))
    w2p = jnp.zeros((h1p, h2p), compute_dtype).at[:h1, :h2].set(w2.astype(compute_dtype))
    b2p = jnp.zeros((1, h2p), jnp.float32).at[:, :h2].set(
        b2.astype(jnp.float32).reshape(1, h2))

    # ---------------- points: cast + pad (padding rows get batch id -1) -------
    xin = x.astype(compute_dtype)
    posin = pos.astype(compute_dtype)
    bid = batch.astype(jnp.int32)
    if n_pad != n:
        pad = n_pad - n
        xin = jnp.pad(xin, ((0, pad), (0, 0)))
        posin = jnp.pad(posin, ((0, pad), (0, 0)))
        bid = jnp.pad(bid, (0, pad), constant_values=-1)
    bid2 = bid.reshape(n_pad, 1)

    # Per-block inclusive graph-id range (scalar prefetch -> bounded pooling loop).
    bid_blk = bid.reshape(n_blocks, tm)
    valid = bid_blk >= 0
    blk_lo = jnp.min(jnp.where(valid, bid_blk, num_graphs), axis=1).astype(jnp.int32)
    blk_hi = jnp.max(jnp.where(valid, bid_blk, -1), axis=1).astype(jnp.int32)
    blk_lo = blk_lo.reshape(ncores, bpc)
    blk_hi = blk_hi.reshape(ncores, bpc)

    row_map = lambda cc, ii, lo, hi: (cc * bpc + ii, 0)   # point-block operands
    rep_map = lambda cc, ii, lo, hi: (0, 0)               # resident parameters

    out = pl.pallas_call(
        _global_sa_kernel,
        out_shape=jax.ShapeDtypeStruct((ncores, bpad, h2p), jnp.float32),
        grid_spec=pltpu.PrefetchScalarGridSpec(
            num_scalar_prefetch=2,
            grid=(ncores, bpc),
            in_specs=[
                pl.BlockSpec((tm, c), row_map),       # x block
                pl.BlockSpec((tm, 3), row_map),       # pos block
                pl.BlockSpec((tm, 1), row_map),       # batch-id block
                pl.BlockSpec((c, h1p), rep_map),      # w1_x
                pl.BlockSpec((3, h1p), rep_map),      # w1_pos
                pl.BlockSpec((1, h1p), rep_map),      # b1
                pl.BlockSpec((h1p, h2p), rep_map),    # w2
                pl.BlockSpec((1, h2p), rep_map),      # b2
            ],
            out_specs=pl.BlockSpec((None, bpad, h2p),
                                   lambda cc, ii, lo, hi: (cc, 0, 0)),
        ),
        compiler_params=pltpu.CompilerParams(
            # outer axis: independent per-core partials; inner axis: reduction
            dimension_semantics=("parallel", "arbitrary"),
        ),
    )(blk_lo, blk_hi, xin, posin, bid2, w1x, w1p, b1p, w2p, b2p)

    # Combine per-core partial maxima; slice off graph / lane padding.
    pooled = jnp.max(out, axis=0)[:num_graphs, :h2]
    pos_out = jnp.zeros((num_graphs, 3), dtype=pos.dtype)
    batch_out = jnp.arange(num_graphs, dtype=jnp.int32)
    return pooled, pos_out, batch_out


def _reference(x, pos, batch, w1, b1, w2, b2, num_graphs):
    xp = jnp.concatenate([x, pos], axis=1)
    h = jnp.maximum(xp @ w1 + b1, 0.0)
    h = jnp.maximum(h @ w2 + b2, 0.0)
    out = jnp.full((num_graphs, h.shape[1]), -jnp.inf, dtype=h.dtype)
    out = out.at[batch].max(h)            # segment max (global_max_pool)
    return out


if __name__ == "__main__":
    key = jax.random.PRNGKey(0)
    k1, k2, k3, k4, k5, k6 = jax.random.split(key, 6)

    # Small, module-consistent shapes; big enough to exercise padding,
    # multiple point blocks, and the dual-core split.
    N, C, B = 300, 4, 3          # points, per-point feature channels, graphs
    CIN = C + 3                  # concat([x, pos])
    H1, H2 = 32, 64              # MLP hidden / output widths

    x = jax.random.normal(k1, (N, C), dtype=jnp.float32)
    pos = jax.random.normal(k2, (N, 3), dtype=jnp.float32)
    # Sorted graph assignment (torch_geometric contract): 120 / 100 / 80 points.
    batch = jnp.concatenate([
        jnp.zeros((120,), jnp.int32),
        jnp.ones((100,), jnp.int32),
        jnp.full((80,), 2, jnp.int32),
    ])

    # Deterministic MLP parameters (synthetic; no checkpoint load).
    w1 = jax.random.normal(k3, (CIN, H1), dtype=jnp.float32) * 0.3
    b1 = jax.random.normal(k4, (H1,), dtype=jnp.float32) * 0.1
    w2 = jax.random.normal(k5, (H1, H2), dtype=jnp.float32) * 0.2
    b2 = jax.random.normal(k6, (H2,), dtype=jnp.float32) * 0.1
    # TODO(synk): the original RigNet MLP also applies BatchNorm after each Linear;
    # in eval mode it folds into the Linear weights, so it is omitted here.

    ref = _reference(x, pos, batch, w1, b1, w2, b2, B)

    # f32 MXU-operand path: tight tolerance, exercises padding + 2-core split.
    feats32, pos_out, batch_out = global_sa_module(
        x, pos, batch, w1, b1, w2, b2, num_graphs=B,
        tm=128, num_cores=2, compute_dtype=jnp.float32)
    feats32 = jax.block_until_ready(feats32)
    np.testing.assert_allclose(np.asarray(feats32), np.asarray(ref),
                               rtol=1e-4, atol=1e-4)

    # bf16 MXU-operand path (v6e/v7x fast path): f32 accumulation, looser tolerance.
    feats_bf, _, _ = global_sa_module(
        x, pos, batch, w1, b1, w2, b2, num_graphs=B,
        tm=128, num_cores=2, compute_dtype=jnp.bfloat16)
    feats_bf = jax.block_until_ready(feats_bf)
    np.testing.assert_allclose(np.asarray(feats_bf), np.asarray(ref),
                               rtol=5e-2, atol=5e-2)

    assert pos_out.shape == (B, 3) and np.all(np.asarray(pos_out) == 0.0)
    assert np.array_equal(np.asarray(batch_out), np.arange(B))

    print("KERNEL_OK")
</pallas_src>

<mosaic_0001>
module attributes {stable_mosaic.version = 11 : i64} {
  func.func @_global_sa_kernel(%arg0: i32, %arg1: i32, %arg2: memref<2x2xi32, #tpu.memory_space<smem>>, %arg3: memref<2x2xi32, #tpu.memory_space<smem>>, %arg4: memref<128x4xf32, #tpu.memory_space<vmem>>, %arg5: memref<128x3xf32, #tpu.memory_space<vmem>>, %arg6: memref<128x1xi32, #tpu.memory_space<vmem>>, %arg7: memref<4x128xf32, #tpu.memory_space<vmem>>, %arg8: memref<3x128xf32, #tpu.memory_space<vmem>>, %arg9: memref<1x128xf32, #tpu.memory_space<vmem>>, %arg10: memref<128x128xf32, #tpu.memory_space<vmem>>, %arg11: memref<1x128xf32, #tpu.memory_space<vmem>>, %arg12: memref<1x8x128xf32, #tpu.memory_space<vmem>>) attributes {dimension_semantics = [#tpu.dimension_semantics<parallel>, #tpu.dimension_semantics<arbitrary>], iteration_bounds = array<i64: 2, 2>, scalar_prefetch = 2 : i64, scratch_operands = 0 : i64, tpu.core_type = #tpu.core_type<tc>, window_params = [{transform_indices = @transform_0, window_bounds = array<i64: 128, 4>}, {transform_indices = @transform_1, window_bounds = array<i64: 128, 3>}, {transform_indices = @transform_2, window_bounds = array<i64: 128, 1>}, {pipeline_mode = #tpu.pipeline_mode<synchronous>, transform_indices = @transform_3, window_bounds = array<i64: 4, 128>}, {pipeline_mode = #tpu.pipeline_mode<synchronous>, transform_indices = @transform_4, window_bounds = array<i64: 3, 128>}, {pipeline_mode = #tpu.pipeline_mode<synchronous>, transform_indices = @transform_5, window_bounds = array<i64: 1, 128>}, {pipeline_mode = #tpu.pipeline_mode<synchronous>, transform_indices = @transform_6, window_bounds = array<i64: 128, 128>}, {pipeline_mode = #tpu.pipeline_mode<synchronous>, transform_indices = @transform_7, window_bounds = array<i64: 1, 128>}, {transform_indices = @transform_8, window_bounds = array<i64: 1, 8, 128>}]} {
    %c0_i32 = arith.constant 0 : i32
    %0 = arith.cmpi eq, %arg1, %c0_i32 : i32
    %1 = arith.extui %0 : i1 to i32
    %c0_i32_0 = arith.constant 0 : i32
    %2 = arith.cmpi ne, %1, %c0_i32_0 : i32
    scf.if %2 {
      %cst_27 = arith.constant 0xFF800000 : f32
      %39 = vector.broadcast %cst_27 : f32 to vector<8x128xf32>
      %c0_28 = arith.constant 0 : index
      %c0_29 = arith.constant 0 : index
      %c0_30 = arith.constant 0 : index
      %40 = vector.load %arg12[%c0_28, %c0_29, %c0_30] : memref<1x8x128xf32, #tpu.memory_space<vmem>>, vector<1x8x128xf32>
      %41 = vector.shape_cast %40 : vector<1x8x128xf32> to vector<8x128xf32>
      %42 = vector.shape_cast %39 : vector<8x128xf32> to vector<1x8x128xf32>
      tpu.vector_store %arg12[%c0_28, %c0_29, %c0_30], %42 {strides = array<i32>} : memref<1x8x128xf32, #tpu.memory_space<vmem>>, vector<1x8x128xf32>,
    } else {
    }
    %c0 = arith.constant 0 : index
    %c0_1 = arith.constant 0 : index
    %3 = vector.load %arg4[%c0, %c0_1] : memref<128x4xf32, #tpu.memory_space<vmem>>, vector<128x4xf32>
    %c0_2 = arith.constant 0 : index
    %c0_3 = arith.constant 0 : index
    %4 = vector.load %arg7[%c0_2, %c0_3] : memref<4x128xf32, #tpu.memory_space<vmem>>, vector<4x128xf32>
    %cst = arith.constant dense<0.000000e+00> : vector<128x128xf32>
    %5 = tpu.matmul %3, %4, %cst {dimension_numbers = #tpu.dot_dimension_numbers<[1], [0], [0], [1], [0, 0, 1, 1], [], []>} : vector<128x4xf32>, vector<4x128xf32>, vector<128x128xf32> -> vector<128x128xf32>
    %c0_4 = arith.constant 0 : index
    %c0_5 = arith.constant 0 : index
    %6 = vector.load %arg5[%c0_4, %c0_5] : memref<128x3xf32, #tpu.memory_space<vmem>>, vector<128x3xf32>
    %c0_6 = arith.constant 0 : index
    %c0_7 = arith.constant 0 : index
    %7 = vector.load %arg8[%c0_6, %c0_7] : memref<3x128xf32, #tpu.memory_space<vmem>>, vector<3x128xf32>
    %cst_8 = arith.constant dense<0.000000e+00> : vector<128x128xf32>
    %8 = tpu.matmul %6, %7, %cst_8 {dimension_numbers = #tpu.dot_dimension_numbers<[1], [0], [0], [1], [0, 0, 1, 1], [], []>} : vector<128x3xf32>, vector<3x128xf32>, vector<128x128xf32> -> vector<128x128xf32>
    %9 = arith.addf %5, %8 : vector<128x128xf32>
    %c0_9 = arith.constant 0 : index
    %c0_10 = arith.constant 0 : index
    %10 = vector.load %arg9[%c0_9, %c0_10] : memref<1x128xf32, #tpu.memory_space<vmem>>, vector<1x128xf32>
    %11 = vector.broadcast %10 : vector<1x128xf32> to vector<128x128xf32>
    %12 = arith.addf %9, %11 : vector<128x128xf32>
    %cst_11 = arith.constant 0.000000e+00 : f32
    %13 = vector.broadcast %cst_11 : f32 to vector<128x128xf32>
    %14 = arith.maximumf %12, %13 : vector<128x128xf32>
    %c0_12 = arith.constant 0 : index
    %c0_13 = arith.constant 0 : index
    %15 = vector.load %arg10[%c0_12, %c0_13] : memref<128x128xf32, #tpu.memory_space<vmem>>, vector<128x128xf32>
    %cst_14 = arith.constant dense<0.000000e+00> : vector<128x128xf32>
    %16 = tpu.matmul %14, %15, %cst_14 {dimension_numbers = #tpu.dot_dimension_numbers<[1], [0], [0], [1], [0, 0, 1, 1], [], []>} : vector<128x128xf32>, vector<128x128xf32>, vector<128x128xf32> -> vector<128x128xf32>
    %c0_15 = arith.constant 0 : index
    %c0_16 = arith.constant 0 : index
    %17 = vector.load %arg11[%c0_15, %c0_16] : memref<1x128xf32, #tpu.memory_space<vmem>>, vector<1x128xf32>
    %18 = vector.broadcast %17 : vector<1x128xf32> to vector<128x128xf32>
    %19 = arith.addf %16, %18 : vector<128x128xf32>
    %cst_17 = arith.constant 0.000000e+00 : f32
    %20 = vector.broadcast %cst_17 : f32 to vector<128x128xf32>
    %21 = arith.maximumf %19, %20 : vector<128x128xf32>
    %c0_18 = arith.constant 0 : index
    %c0_19 = arith.constant 0 : index
    %22 = vector.load %arg6[%c0_18, %c0_19] : memref<128x1xi32, #tpu.memory_space<vmem>>, vector<128x1xi32>
    %23 = tpu.iota {dimensions = array<i32: 0>} : vector<8x1xi32>
    %24 = arith.index_cast %arg0 : i32 to index
    %25 = arith.index_cast %arg1 : i32 to index
    %26 = memref.load %arg2[%24, %25] : memref<2x2xi32, #tpu.memory_space<smem>>
    %27 = arith.index_cast %arg0 : i32 to index
    %28 = arith.index_cast %arg1 : i32 to index
    %29 = memref.load %arg3[%27, %28] : memref<2x2xi32, #tpu.memory_space<smem>>
    %c1_i32 = arith.constant 1 : i32
    %30 = arith.addi %29, %c1_i32 : i32
    %c0_20 = arith.constant 0 : index
    %c0_21 = arith.constant 0 : index
    %c0_22 = arith.constant 0 : index
    %31 = vector.load %arg12[%c0_20, %c0_21, %c0_22] : memref<1x8x128xf32, #tpu.memory_space<vmem>>, vector<1x8x128xf32>
    %32 = vector.shape_cast %31 : vector<1x8x128xf32> to vector<8x128xf32>
    %33 = arith.subi %30, %26 : i32
    %34 = arith.addi %26, %33 : i32
    %c1_i32_23 = arith.constant 1 : i32
    %35 = scf.for %arg13 = %26 to %34 step %c1_i32_23 iter_args(%arg14 = %32) -> (vector<8x128xf32>)  : i32 {
      %39 = vector.broadcast %arg13 : i32 to vector<128x1xi32>
      %40 = arith.cmpi eq, %22, %39 : vector<128x1xi32>
      %cst_27 = arith.constant 0xFF800000 : f32
      %41 = vector.shape_cast %40 : vector<128x1xi1> to vector<128x1xi1>
      %42 = vector.broadcast %41 : vector<128x1xi1> to vector<128x128xi1>
      %43 = vector.broadcast %cst_27 : f32 to vector<128x128xf32>
      %44 = arith.select %42, %21, %43 : vector<128x128xi1>, vector<128x128xf32>
      %cst_28 = arith.constant dense<0xFF800000> : vector<128xf32>
      %45 = vector.multi_reduction <maximumf>, %44, %cst_28 [0] : vector<128x128xf32> to vector<128xf32>
      %46 = vector.shape_cast %45 : vector<128xf32> to vector<1x128xf32>
      %47 = vector.broadcast %arg13 : i32 to vector<8x1xi32>
      %48 = arith.cmpi eq, %23, %47 : vector<8x1xi32>
      %cst_29 = arith.constant 0xFF800000 : f32
      %49 = vector.shape_cast %48 : vector<8x1xi1> to vector<8x1xi1>
      %50 = vector.broadcast %49 : vector<8x1xi1> to vector<8x128xi1>
      %51 = vector.shape_cast %46 : vector<1x128xf32> to vector<1x128xf32>
      %52 = vector.broadcast %51 : vector<1x128xf32> to vector<8x128xf32>
      %53 = vector.broadcast %cst_29 : f32 to vector<8x128xf32>
      %54 = arith.select %50, %52, %53 : vector<8x128xi1>, vector<8x128xf32>
      %55 = arith.maximumf %arg14, %54 : vector<8x128xf32>
      scf.yield %55 : vector<8x128xf32>
    }
    %c0_24 = arith.constant 0 : index
    %c0_25 = arith.constant 0 : index
    %c0_26 = arith.constant 0 : index
    %36 = vector.load %arg12[%c0_24, %c0_25, %c0_26] : memref<1x8x128xf32, #tpu.memory_space<vmem>>, vector<1x8x128xf32>
    %37 = vector.shape_cast %36 : vector<1x8x128xf32> to vector<8x128xf32>
    %38 = vector.shape_cast %35 : vector<8x128xf32> to vector<1x8x128xf32>
    tpu.vector_store %arg12[%c0_24, %c0_25, %c0_26], %38 {strides = array<i32>} : memref<1x8x128xf32, #tpu.memory_space<vmem>>, vector<1x8x128xf32>,
    return
  }
  func.func @transform_0(%arg0: i32, %arg1: i32, %arg2: memref<2x2xi32, #tpu.memory_space<smem>>, %arg3: memref<2x2xi32, #tpu.memory_space<smem>>) -> (i32, i32) {
    %c2_i32 = arith.constant 2 : i32
    %0 = arith.muli %arg0, %c2_i32 : i32
    %1 = arith.addi %0, %arg1 : i32
    %c0_i32 = arith.constant 0 : i32
    %c0_i32_0 = arith.constant 0 : i32
    return %1, %c0_i32 : i32, i32
  }
  func.func @transform_1(%arg0: i32, %arg1: i32, %arg2: memref<2x2xi32, #tpu.memory_space<smem>>, %arg3: memref<2x2xi32, #tpu.memory_space<smem>>) -> (i32, i32) {
    %c2_i32 = arith.constant 2 : i32
    %0 = arith.muli %arg0, %c2_i32 : i32
    %1 = arith.addi %0, %arg1 : i32
    %c0_i32 = arith.constant 0 : i32
    %c0_i32_0 = arith.constant 0 : i32
    return %1, %c0_i32 : i32, i32
  }
  func.func @transform_2(%arg0: i32, %arg1: i32, %arg2: memref<2x2xi32, #tpu.memory_space<smem>>, %arg3: memref<2x2xi32, #tpu.memory_space<smem>>) -> (i32, i32) {
    %c2_i32 = arith.constant 2 : i32
    %0 = arith.muli %arg0, %c2_i32 : i32
    %1 = arith.addi %0, %arg1 : i32
    %c0_i32 = arith.constant 0 : i32
    %c0_i32_0 = arith.constant 0 : i32
    return %1, %c0_i32 : i32, i32
  }
  func.func @transform_3(%arg0: i32, %arg1: i32, %arg2: memref<2x2xi32, #tpu.memory_space<smem>>, %arg3: memref<2x2xi32, #tpu.memory_space<smem>>) -> (i32, i32) {
    %c0_i32 = arith.constant 0 : i32
    %c0_i32_0 = arith.constant 0 : i32
    %c0_i32_1 = arith.constant 0 : i32
    return %c0_i32, %c0_i32_0 : i32, i32
  }
  func.func @transform_4(%arg0: i32, %arg1: i32, %arg2: memref<2x2xi32, #tpu.memory_space<smem>>, %arg3: memref<2x2xi32, #tpu.memory_space<smem>>) -> (i32, i32) {
    %c0_i32 = arith.constant 0 : i32
    %c0_i32_0 = arith.constant 0 : i32
    %c0_i32_1 = arith.constant 0 : i32
    return %c0_i32, %c0_i32_0 : i32, i32
  }
  func.func @transform_5(%arg0: i32, %arg1: i32, %arg2: memref<2x2xi32, #tpu.memory_space<smem>>, %arg3: memref<2x2xi32, #tpu.memory_space<smem>>) -> (i32, i32) {
    %c0_i32 = arith.constant 0 : i32
    %c0_i32_0 = arith.constant 0 : i32
    %c0_i32_1 = arith.constant 0 : i32
    return %c0_i32, %c0_i32_0 : i32, i32
  }
  func.func @transform_6(%arg0: i32, %arg1: i32, %arg2: memref<2x2xi32, #tpu.memory_space<smem>>, %arg3: memref<2x2xi32, #tpu.memory_space<smem>>) -> (i32, i32) {
    %c0_i32 = arith.constant 0 : i32
    %c0_i32_0 = arith.constant 0 : i32
    %c0_i32_1 = arith.constant 0 : i32
    return %c0_i32, %c0_i32_0 : i32, i32
  }
  func.func @transform_7(%arg0: i32, %arg1: i32, %arg2: memref<2x2xi32, #tpu.memory_space<smem>>, %arg3: memref<2x2xi32, #tpu.memory_space<smem>>) -> (i32, i32) {
    %c0_i32 = arith.constant 0 : i32
    %c0_i32_0 = arith.constant 0 : i32
    %c0_i32_1 = arith.constant 0 : i32
    return %c0_i32, %c0_i32_0 : i32, i32
  }
  func.func @transform_8(%arg0: i32, %arg1: i32, %arg2: memref<2x2xi32, #tpu.memory_space<smem>>, %arg3: memref<2x2xi32, #tpu.memory_space<smem>>) -> (i32, i32, i32) {
    %c0_i32 = arith.constant 0 : i32
    %c0_i32_0 = arith.constant 0 : i32
    %c0_i32_1 = arith.constant 0 : i32
    return %arg0, %c0_i32, %c0_i32_0 : i32, i32, i32
  }
}

</mosaic_0001>

<bundles_post_ra>
// kernel: tpu_custom_call.1
= control target key start
LH: loop header
LB: loop body
LE: loop exit
PB: predicated region body
PF: predicated region fallthrough
CT: control target
= control target key end

     0   :  { %s2439_s0 = inlined_call_operand.vmem [shape: s32[2,2], index: 0, kind: input, shape index: {}]   ;;  %s2440_s2 = inlined_call_operand.vmem [shape: f32[512,4], index: 2, kind: input, shape index: {}]   ;;  %s2441_s3 = inlined_call_operand.vmem [shape: f32[512,3], index: 3, kind: input, shape index: {}]   ;;  %s2442_s4 = inlined_call_operand.vmem [shape: s32[512,1], index: 4, kind: input, shape index: {}]   ;;  %s2443_s5 = inlined_call_operand.vmem [shape: f32[4,128], index: 5, kind: input, shape index: {}]   ;;  %s2444_s6 = inlined_call_operand.vmem [shape: f32[3,128], index: 6, kind: input, shape index: {}]   ;;  %s2445_s7 = inlined_call_operand.vmem [shape: f32[1,128], index: 7, kind: input, shape index: {}]   ;;  %s2446_s8 = inlined_call_operand.vmem [shape: f32[128,128], index: 8, kind: input, shape index: {}]   ;;  %s2447_s9 = inlined_call_operand.vmem [shape: f32[1,128], index: 9, kind: input, shape index: {}]   ;;  %s2448_s10 = inlined_call_operand.hbm [shape: f32[2,8,128], index: 10, kind: output, shape index: {}]   ;;  %s2449_s1 = inlined_call_operand.vmem [shape: s32[2,2], index: 1, kind: input, shape index: {}]  }
   0x1   :  { %s15_s15 = sshll.u32 %s2439_s0, 4  ;;  %s19_s18 = sshll.u32 %s2449_s1, 4  ;;  %s16_s15 = int_to_ptr.vmem [resolvable:$true] %s15_s15  ;;  %s20_s18 = int_to_ptr.vmem [resolvable:$true] %s19_s18 }
   0x2   :  { %s1752_s19 = scalar_lea.vmem %s16_s15, 32  ;;  %p1757_p1 = scmp.lt.s32.totalorder %s16_s15, %s16_s15 }
   0x3   :  { %p1753_p0 = scmp.ne.s32.totalorder %s16_s15, %s1752_s19  ;;  %p1758_p2 = scmp.lt.s32.totalorder %s1752_s19, %s1752_s19 }
   0x5   :  { %p1759_p3 = por %p1758_p2, %p1757_p1 }
   0x7   :  { %p1760_p4 = pnand %p1759_p3, %p1753_p0 }
   0x9   :  { %1763 = shalt.err (!%p1760_p4)  }
   0xa   :  { %s1898_s20 = smov [#allocation3]   ;;  %s1764_s21 = scalar_lea.vmem %s20_s18, 32 }
   0xb   :  { %18 = dma.vmem_to_smem %s16_s15, 32, %s1898_s20, [#allocation2] }
   0xc   :  { %p1765_p5 = scmp.ne.s32.totalorder %s20_s18, %s1764_s21  ;;  %p1769_p6 = scmp.lt.s32.totalorder %s20_s18, %s20_s18 }
   0xd   :  { %p1770_p7 = scmp.lt.s32.totalorder %s1764_s21, %s1764_s21 }
   0xf   :  { %p1771_p8 = por %p1770_p7, %p1769_p6 }
  0x11   :  { %p1772_p9 = pnand %p1771_p8, %p1765_p5 }
  0x13   :  { %1775 = shalt.err (!%p1772_p9)  }
  0x14   :  { %s1899_s0 = smov [#allocation4]  }
  0x15   :  { %22 = dma.vmem_to_smem %s20_s18, 32, %s1899_s0, [#allocation2] }
  0x16   :  { %1848 = dma.done.wait [#allocation2], 64 }
  0x17   :  { %1849 = vsyncadd [#allocation2], 4294967232 }
  0x18   :  { %24 = sfence }
  0x19   :  { %25 = vsyncpa [#allocation6], 0 }
  0x1a   :  { %27 = vsyncpa [#allocation6 + $0x1], 0  ;;  %s1964_s1 = smov 0   ;;  %s1966_s22 = smov 0  }
  0x1b   :  { %s1968_s23 = smov 0   ;;  %s1970_s24 = smov 0  }
  0x1c   :  { %s1972_s25 = smov 0   ;;  %s1974_s26 = smov 0  }
  0x1d   :  { %s1976_s27 = smov 0   ;;  %s1978_s28 = smov 0  }
  0x1e LB: > { %2454 = sst [smem:[#allocation9_spill]] %s1864_s23  ;;  %s1366_s29 = sadd.s32 4294967295, %s1884_s28   ;;  %s1884_s28 = sphi %s1978_s28, %s33_s28   ;;  %s1880_s27 = sphi %s1976_s27, %s2483_s27   ;;  %s1876_s26 = sphi %s1974_s26, %s2482_s26   ;;  %s1872_s25 = sphi %s1972_s25, %s2481_s25   ;;  %s1868_s24 = sphi %s1970_s24, %s2480_s24   ;;  %s1864_s23 = sphi %s1968_s23, %s2479_s23   ;;  %s1860_s22 = sphi %s1966_s22, %s2485_s22   ;;  %s1856_s1 = sphi %s1964_s1, %s2484_s1  }
  0x1f   : > { %2455 = sst [smem:[#allocation10_spill]] %s1876_s26  ;;  %s1367_s30 = sadd.s32 4294967294, %s1884_s28  }
  0x20   : > { %2456 = sst [smem:[#allocation11_spill]] %s1880_s27  ;;  %s42_s11 = sadd.s32 1, %s1876_s26 }
  0x21   : > { %p43_p10 = scmp.ge.s32.totalorder %s42_s11, 2  ;;  %s45_s12 = sadd.s32 1, %s1880_s27 }
  0x22   : > { %p257_p11 = scmp.ne.s32.totalorder %s1864_s23, %s1860_s22  ;;  %p258_p12 = scmp.eq.s32.totalorder %s1366_s29, 3 }
  0x23   : > { %s2487_s11 = smov (%p43_p10, %s42_s11), 0  ;;  %s2489_s12 = smov (!%p43_p10, %s45_s12), %s1880_s27 }
  0x24   : > { %2457 = sst [smem:[#allocation12_spill]] %s2487_s11  ;;  %p2013_p13 = por %p258_p12, %p257_p11 }
  0x25   : > { %p263_p0 = scmp.ne.s32.totalorder %s1860_s22, %s1856_s1  ;;  %p47_p1 = scmp.ge.s32.totalorder %s2489_s12, 2 }
  0x26   : > { %p264_p2 = scmp.eq.s32.totalorder %s1367_s30, 3  ;;  %p1376_p3 = scmp.ge.s32.totalorder %s1884_s28, 1 }
  0x27   : > { %p336_p4 = scmp.lt.s32.totalorder %s1884_s28, 5  ;;  %s2491_s12 = smov (%p47_p1, %s2489_s12), 0 }
  0x28   : > { %2459 = sst [smem:[#allocation13_spill]] %s2491_s12  ;;  %p2023_p5 = por %p264_p2, %p263_p0 }
  0x29   : > { %p337_p6 = pnand %p1376_p3, %p336_p4  ;;  %s244_s15 = ssub.s32 %s1880_s27, %s2491_s12 }
  0x2a   : > { %s247_s16 = sadd.s32 1, %s1864_s23  ;;  %p245_p7 = scmp.eq.s32.totalorder %s244_s15, 0 }
  0x2b   : > { %340 = sbr.rel (%p337_p6) target bundleno = 759 (0x2f7), region = 52  ;;  %s383_s18 = sand.u32 (!%p337_p6), 1, %s1860_s22  }
  0x2c   : > { %s2031_s17 = scalar_select %p245_p7, %s1864_s23, %s247_s16  }
  0x2d   : > { %s1378_s19 = sshll.u32 (!%p337_p6), %s1872_s25, 1  ;;  %s1377_s20 = sshll.u32 (!%p337_p6), %s383_s18, 3 }
  0x2e   : > { %2461 = sst [smem:[#allocation14_spill]] %s2031_s17  ;;  %s387_s21 = sadd.s32 (!%p337_p6), %s1868_s24, %s1378_s19 }
  0x2f   : > { %s1379_s0 = sshll.u32 (!%p337_p6), %s387_s21, 4  ;;  %s2053_s19 = scalar_lea.vmem (!%p337_p6), [#allocation5], %s1377_s20 }
  0x30   : > { %p389_p8 = scmp.lt.s32.totalorder (!%p337_p6), %s1379_s0, 63  ;;  %p1387_p9 = scmp.ne.s32.totalorder (!%p337_p6), %s1868_s24, 0 }
  0x32   : > { %s2493_s0 = smov (!%p389_p8, %s1379_s0), 63  ;;  %419 = sbr.rel (%p1387_p9) target bundleno = 57 (0x39), region = 56 }
  0x33   : > { %s1380_s29 = sshll.u32 %s2493_s0, 3  ;;  %v1900_v0 = vmov (!%p1387_p9), -inf  }
  0x34   : > { %s2041_s15 = scalar_lea.vmem %s2440_s2, %s1380_s29  ;;  %s2046_s27 = scalar_lea.vmem %s2441_s3, %s1380_s29  ;;  %420 = vst [vmem:[%s2053_s19] sm:$0xff] (!%p1387_p9), %v1900_v0 }
  0x35   : > { %s2051_s23 = scalar_lea.vmem %s2442_s4, %s1380_s29 }
  0x39 PF: > { %v454_v1 = vld [vmem:[%s2444_s6] sm:$0x7]  ;;  %vm504_vm0 = vcmask 1042432   ;;  %vm455_vm1 = vcmask 23552   ;;  %v439_v3 = vld [vmem:[%s2046_s27 + $0x8] sm:$0xff]  ;;  %vm702_vm2 = vcmask 1043456  }
  0x3a   : > { %v438_v2 = vld [vmem:[%s2046_s27] sm:$0xff]  ;;  %1495 = vmatprep.subr.msk.mxu0 %vm504_vm0, %v454_v1  ;;  %v440_v5 = vld [vmem:[%s2046_s27 + $0x10] sm:$0xff]  ;;  %v441_v6 = vld [vmem:[%s2046_s27 + $0x18] sm:$0xff]  ;;  %vm653_vm3 = vcmask 31744   ;;  %s1097_s16 = sand.u32 127, %s1868_s24 }
  0x3b   : > { %1497 = vmatprep.mubr.msk.f32.mxu0 %vm455_vm1, %v438_v2  ;;  %v437_v4 = vld [vmem:[%s2443_s5] sm:$0xf]  ;;  %1496 = vmatpush3.msk.msra.mxu0 %vm504_vm0, %v454_v1  ;;  %v443_v8 = vld [vmem:[%s2046_s27 + $0x28] sm:$0xff]  ;;  %v444_v9 = vld [vmem:[%s2046_s27 + $0x30] sm:$0xff] }
  0x3c   : > { %1498 = vmatmul.mubr.msk.f32.vlgmr.msra.gmra.mrb[0].mxu0 %vm455_vm1, %v439_v3  ;;  %1521 = vmatprep.subr.msk.mxu0 %vm702_vm2, %v437_v4  ;;  %v442_v7 = vld [vmem:[%s2046_s27 + $0x20] sm:$0xff]  ;;  %v891_v11 = vld [vmem:[%s2446_s8 + $0x8] sm:$0xff]  ;;  %v445_v12 = vld [vmem:[%s2046_s27 + $0x38] sm:$0xff] }
  0x3d   : > { %1522 = vmatpush3.msk.msra.mxu0 %vm702_vm2, %v437_v4  ;;  %1500 = vmatprep.mubr.msk.f32.mxu0 %vm455_vm1, %v440_v5  ;;  %v890_v10 = vld [vmem:[%s2446_s8] sm:$0xff]  ;;  %v892_v14 = vld [vmem:[%s2446_s8 + $0x10] sm:$0xff]  ;;  %v893_v15 = vld [vmem:[%s2446_s8 + $0x18] sm:$0xff] }
  0x3e   : > { %v1603_v13 = vpack.c.bf16 %v891_v11, %v890_v10  ;;  %v446_v16 = vld [vmem:[%s2046_s27 + $0x40] sm:$0xff]  ;;  %v1607_v17 = vpack.c.bf16 %v893_v15, %v892_v14  ;;  %v895_v19 = vld [vmem:[%s2446_s8 + $0x28] sm:$0xff]  ;;  %v448_v22 = vld [vmem:[%s2046_s27 + $0x50] sm:$0xff] }
  0x3f   : > { %v894_v18 = vld [vmem:[%s2446_s8 + $0x20] sm:$0xff]  ;;  %v447_v20 = vld [vmem:[%s2046_s27 + $0x48] sm:$0xff]  ;;  %v896_v23 = vld [vmem:[%s2446_s8 + $0x30] sm:$0xff] }
  0x40   : > { %1501 = vmatmul.mubr.msk.f32.gmra.mrb[2].mxu0 %vm455_vm1, %v441_v6  ;;  %1604 = vmatprep.subr.bf16.mxu1 %v1603_v13  ;;  %v1611_v21 = vpack.c.bf16 %v895_v19, %v894_v18  ;;  %v897_v24 = vld [vmem:[%s2446_s8 + $0x38] sm:$0xff]  ;;  %v450_v27 = vld [vmem:[%s2046_s27 + $0x60] sm:$0xff]  ;;  %v899_v29 = vld [vmem:[%s2446_s8 + $0x48] sm:$0xff] }
  0x41   : > { %1503 = vmatprep.mubr.msk.f32.mxu0 %vm455_vm1, %v442_v7  ;;  %1606 = vmatpush3.bf16.msra.mxu1 %v1603_v13  ;;  %v449_v25 = vld [vmem:[%s2046_s27 + $0x58] sm:$0xff]  ;;  %v1615_v26 = vpack.c.bf16 %v897_v24, %v896_v23  ;;  %v898_v28 = vld [vmem:[%s2446_s8 + $0x40] sm:$0xff]  ;;  %v451_v30 = vld [vmem:[%s2046_s27 + $0x68] sm:$0xff] }
  0x42   : > { %1608 = vmatprep.subr.bf16.mxu1 %v1607_v17  ;;  %v1619_v31 = vpack.c.bf16 %v899_v29, %v898_v28  ;;  %v452_v32 = vld [vmem:[%s2046_s27 + $0x70] sm:$0xff]  ;;  %v901_v34 = vld [vmem:[%s2446_s8 + $0x58] sm:$0xff]  ;;  %v421_v37 = vld [vmem:[%s2041_s15] sm:$0xff] }
  0x43   : > { %v900_v33 = vld [vmem:[%s2446_s8 + $0x50] sm:$0xff]  ;;  %v453_v35 = vld [vmem:[%s2046_s27 + $0x78] sm:$0xff]  ;;  %v902_v38 = vld [vmem:[%s2446_s8 + $0x60] sm:$0xff] }
  0x44   : > { %1504 = vmatmul.mubr.msk.f32.gmra.mrb[4].mxu0 %vm455_vm1, %v443_v8  ;;  %v1623_v36 = vpack.c.bf16 %v901_v34, %v900_v33  ;;  %v903_v39 = vld [vmem:[%s2446_s8 + $0x68] sm:$0xff]  ;;  %v423_v42 = vld [vmem:[%s2041_s15 + $0x10] sm:$0xff]  ;;  %v424_v43 = vld [vmem:[%s2041_s15 + $0x18] sm:$0xff] }
  0x45   : > { %1506 = vmatprep.mubr.msk.f32.mxu0 %vm455_vm1, %v444_v9  ;;  %1610 = vmatpush3.bf16.msra.mxu1 %v1607_v17  ;;  %v422_v40 = vld [vmem:[%s2041_s15 + $0x8] sm:$0xff]  ;;  %v1627_v41 = vpack.c.bf16 %v903_v39, %v902_v38  ;;  %v425_v44 = vld [vmem:[%s2041_s15 + $0x20] sm:$0xff]  ;;  %v427_v46 = vld [vmem:[%s2041_s15 + $0x30] sm:$0xff] }
  0x46   : > { %1612 = vmatprep.subr.bf16.mxu1 %v1611_v21  ;;  %v426_v45 = vld [vmem:[%s2041_s15 + $0x28] sm:$0xff]  ;;  %v428_v47 = vld [vmem:[%s2041_s15 + $0x38] sm:$0xff]  ;;  %v429_v48 = vld [vmem:[%s2041_s15 + $0x40] sm:$0xff] }
  0x47   : > { %v430_v49 = vld [vmem:[%s2041_s15 + $0x48] sm:$0xff]  ;;  %v431_v50 = vld [vmem:[%s2041_s15 + $0x50] sm:$0xff]  ;;  %v432_v51 = vld [vmem:[%s2041_s15 + $0x58] sm:$0xff] }
  0x48   : > { %1507 = vmatmul.mubr.msk.f32.gmra.mrb[6].mxu0 %vm455_vm1, %v445_v12  ;;  %v433_v52 = vld [vmem:[%s2041_s15 + $0x60] sm:$0xff]  ;;  %v434_v53 = vld [vmem:[%s2041_s15 + $0x68] sm:$0xff]  ;;  %v435_v54 = vld [vmem:[%s2041_s15 + $0x70] sm:$0xff] }
  0x49   : > { %1509 = vmatprep.mubr.msk.f32.mxu0 %vm455_vm1, %v446_v16  ;;  %1614 = vmatpush3.bf16.msra.mxu1 %v1611_v21  ;;  %v436_v55 = vld [vmem:[%s2041_s15 + $0x78] sm:$0xff]  ;;  %v904_v56 = vld [vmem:[%s2446_s8 + $0x70] sm:$0xff]  ;;  %v1422_v59 = vld [vmem:[%s2445_s7] ss:$0 sm:$0xff]  ;;  %s1092_s15 = sshra.s32 %s1868_s24, 7 }
  0x4a   : > { %1616 = vmatprep.subr.bf16.mxu1 %v1615_v26  ;;  %v905_v57 = vld [vmem:[%s2446_s8 + $0x78] sm:$0xff]  ;;  %s1094_s29 = sadd.s32 %s1872_s25, %s1092_s15 }
  0x4b   : > { %v1631_v58 = vpack.c.bf16 %v905_v57, %v904_v56  ;;  %s1424_s30 = sshll.u32 %s1094_s29, 7  ;;  %v2219_v56 = vld [vmem:[%s2051_s23 + $0x50] sm:$0xff]  ;;  %v2222_v57 = vld [vmem:[%s2051_s23 + $0x58] sm:$0xff] }
  0x4c   : > { %1510 = vmatmul.mubr.msk.f32.gmra.mrb[8].mxu0 %vm455_vm1, %v447_v20  ;;  %s1098_s12 = sadd.s32 %s1424_s30, %s1097_s16 }
  0x4d   : > { %1512 = vmatprep.mubr.msk.f32.mxu0 %vm455_vm1, %v448_v22  ;;  %1618 = vmatpush3.bf16.msra.mxu1 %v1615_v26  ;;  %s2181_s21 = sld [smem:[#allocation4 + %s1098_s12]] }
  0x4e   : > { %1620 = vmatprep.subr.bf16.mxu1 %v1619_v31  ;;  %s2194_s24 = sld [smem:[#allocation3 + %s1098_s12]]  }
  0x50   : > { %1513 = vmatmul.mubr.msk.f32.gmra.mrb[10].mxu0 %vm455_vm1, %v449_v25 }
  0x51   : > { %1515 = vmatprep.mubr.msk.f32.mxu0 %vm455_vm1, %v450_v27  ;;  %1622 = vmatpush3.bf16.msra.mxu1 %v1619_v31 }
  0x52   : > { %1624 = vmatprep.subr.bf16.mxu1 %v1623_v36 }
  0x53   : > { %s1101_s27 = sadd.s32 1, %s2181_s21 }
  0x54   : > { %1516 = vmatmul.mubr.msk.f32.gmra.mrb[12].mxu0 %vm455_vm1, %v451_v30  ;;  %p1315_p10 = scmp.ge.s32.totalorder %s2194_s24, %s1101_s27 }
  0x55   : > { %1518 = vmatprep.mubr.msk.f32.mxu0 %vm455_vm1, %v452_v32  ;;  %1626 = vmatpush3.bf16.msra.mxu1 %v1623_v36 }
  0x56   : > { %1628 = vmatprep.subr.bf16.mxu1 %v1627_v41 }
  0x58   : > { %1519 = vmatmul.mubr.msk.f32.gmra.mrb[14].mxu0 %vm455_vm1, %v453_v35 }
  0x59   : > { %1523 = vmatprep.mubr.msk.f32.mxu0 %vm653_vm3, %v421_v37  ;;  %1630 = vmatpush3.bf16.msra.mxu1 %v1627_v41 }
  0x5a   : > { %1632 = vmatprep.subr.bf16.mxu1 %v1631_v58 }
  0x5c   : > { %1524 = vmatmul.mubr.msk.f32.vlgmr.msra.gmra.mrb[0].mxu0 %vm653_vm3, %v422_v40 }
  0x5d   : > { %1526 = vmatprep.mubr.msk.f32.mxu0 %vm653_vm3, %v423_v42  ;;  %1634 = vmatpush3.bf16.msra.mxu1 %v1631_v58  ;;  %v2225_v58 = vld [vmem:[%s2051_s23 + $0x60] sm:$0xff] }
  0x60   : > { %1527 = vmatmul.mubr.msk.f32.gmra.mrb[2].mxu0 %vm653_vm3, %v424_v43 }
  0x61   : > { %1529 = vmatprep.mubr.msk.f32.mxu0 %vm653_vm3, %v425_v44  ;;  %v1090_v44 = vlaneseq }
  0x64   : > { %1530 = vmatmul.mubr.msk.f32.gmra.mrb[4].mxu0 %vm653_vm3, %v426_v45  ;;  %v2184_v45 = vld [vmem:[%s2051_s23] sm:$0xff] }
  0x65   : > { %1532 = vmatprep.mubr.msk.f32.mxu0 %vm653_vm3, %v427_v46  ;;  %v2187_v46 = vld [vmem:[%s2051_s23 + $0x8] sm:$0xff] }
  0x68   : > { %1533 = vmatmul.mubr.msk.f32.gmra.mrb[6].mxu0 %vm653_vm3, %v428_v47  ;;  %v2190_v47 = vld [vmem:[%s2051_s23 + $0x10] sm:$0xff] }
  0x69   : > { %1535 = vmatprep.mubr.msk.f32.mxu0 %vm653_vm3, %v429_v48  ;;  %v2192_v48 = vshrl.u32 %v1090_v44, 7 }
  0x6c   : > { %1536 = vmatmul.mubr.msk.f32.gmra.mrb[8].mxu0 %vm653_vm3, %v430_v49  ;;  %v2198_v49 = vld [vmem:[%s2051_s23 + $0x18] sm:$0xff] }
  0x6d   : > { %1538 = vmatprep.mubr.msk.f32.mxu0 %vm653_vm3, %v431_v50  ;;  %v2201_v50 = vld [vmem:[%s2051_s23 + $0x20] sm:$0xff] }
  0x70   : > { %1539 = vmatmul.mubr.msk.f32.gmra.mrb[10].mxu0 %vm653_vm3, %v432_v51  ;;  %v2204_v51 = vld [vmem:[%s2051_s23 + $0x28] sm:$0xff] }
  0x71   : > { %1541 = vmatprep.mubr.msk.f32.mxu0 %vm653_vm3, %v433_v52  ;;  %v2207_v52 = vld [vmem:[%s2051_s23 + $0x30] sm:$0xff] }
  0x74   : > { %1542 = vmatmul.mubr.msk.f32.gmra.mrb[12].mxu0 %vm653_vm3, %v434_v53  ;;  %v2210_v53 = vld [vmem:[%s2051_s23 + $0x38] sm:$0xff] }
  0x75   : > { %1544 = vmatprep.mubr.msk.f32.mxu0 %vm653_vm3, %v435_v54  ;;  %v2213_v54 = vld [vmem:[%s2051_s23 + $0x40] sm:$0xff] }
  0x78   : > { %1545 = vmatmul.mubr.msk.f32.gmra.mrb[14].mxu0 %vm653_vm3, %v436_v55  ;;  %v2216_v55 = vld [vmem:[%s2051_s23 + $0x48] sm:$0xff] }
 0x12f   : > { %v1525_v60 = vpop.f32.mrb[0].mxu0 }
 0x130   : > { %v859_v61 = vadd.f32 %v1525_v60, %v1422_v59  ;;  %v772_v62 = vpop.f32.mrb[1].mxu0  ;;  %v2231_v60 = vld [vmem:[%s2051_s23 + $0x70] sm:$0xff] }
 0x131   : > { %v858_v63 = vadd.f32 %v1422_v59, %v772_v62  ;;  %v1102_v62 = vld [vmem:[%s2053_s19] sm:$0xff]  }
 0x132   : > { %v875_v2 = vmax.f32 %v859_v61, 0.0  ;;  %v2234_v61 = vld [vmem:[%s2051_s23 + $0x78] sm:$0xff] }
 0x133   : > { %v1528_v0 = vpop.f32.mrb[2].mxu0  ;;  %v874_v1 = vmax.f32 %v858_v63, 0.0  ;;  %v1423_v63 = vld [vmem:[%s2447_s9] ss:$0 sm:$0xff] }
 0x134   : > { %v861_v3 = vadd.f32 %v1528_v0, %v1422_v59  ;;  %v782_v4 = vpop.f32.mrb[3].mxu0 }
 0x135   : > { %v860_v5 = vadd.f32 %v1422_v59, %v782_v4  ;;  %1579 = vmatprep.mubr.f32.mxu1 %v874_v1 }
 0x136   : > { %1580 = vmatmul.mubr.f32.vlgmr.msra.gmra.mrb[0].mxu1 %v875_v2  ;;  %v877_v8 = vmax.f32 %v861_v3, 0.0 }
 0x137   : > { %v876_v6 = vmax.f32 %v860_v5, 0.0  ;;  %v1531_v7 = vpop.f32.mrb[4].mxu0 }
 0x138   : > { %v863_v9 = vadd.f32 %v1531_v7, %v1422_v59  ;;  %v792_v10 = vpop.f32.mrb[5].mxu0 }
 0x139   : > { %v862_v11 = vadd.f32 %v1422_v59, %v792_v10  ;;  %1582 = vmatprep.mubr.f32.mxu1 %v876_v6 }
 0x13a   : > { %1583 = vmatmul.mubr.f32.gmra.mrb[2].mxu1 %v877_v8  ;;  %v879_v14 = vmax.f32 %v863_v9, 0.0 }
 0x13b   : > { %v878_v12 = vmax.f32 %v862_v11, 0.0  ;;  %v1534_v13 = vpop.f32.mrb[6].mxu0 }
 0x13c   : > { %v865_v15 = vadd.f32 %v1534_v13, %v1422_v59  ;;  %v802_v16 = vpop.f32.mrb[7].mxu0 }
 0x13d   : > { %v864_v17 = vadd.f32 %v1422_v59, %v802_v16  ;;  %1585 = vmatprep.mubr.f32.mxu1 %v878_v12 }
 0x13e   : > { %1586 = vmatmul.mubr.f32.gmra.mrb[4].mxu1 %v879_v14  ;;  %v881_v20 = vmax.f32 %v865_v15, 0.0 }
 0x13f   : > { %v880_v18 = vmax.f32 %v864_v17, 0.0  ;;  %v1537_v19 = vpop.f32.mrb[8].mxu0 }
 0x140   : > { %v867_v21 = vadd.f32 %v1537_v19, %v1422_v59  ;;  %v812_v22 = vpop.f32.mrb[9].mxu0 }
 0x141   : > { %v866_v23 = vadd.f32 %v1422_v59, %v812_v22  ;;  %1588 = vmatprep.mubr.f32.mxu1 %v880_v18 }
 0x142   : > { %1589 = vmatmul.mubr.f32.gmra.mrb[6].mxu1 %v881_v20  ;;  %v883_v26 = vmax.f32 %v867_v21, 0.0 }
 0x143   : > { %v882_v24 = vmax.f32 %v866_v23, 0.0  ;;  %v1540_v25 = vpop.f32.mrb[10].mxu0 }
 0x144   : > { %v869_v27 = vadd.f32 %v1540_v25, %v1422_v59  ;;  %v822_v28 = vpop.f32.mrb[11].mxu0 }
 0x145   : > { %v868_v29 = vadd.f32 %v1422_v59, %v822_v28  ;;  %1591 = vmatprep.mubr.f32.mxu1 %v882_v24 }
 0x146   : > { %1592 = vmatmul.mubr.f32.gmra.mrb[8].mxu1 %v883_v26  ;;  %v885_v32 = vmax.f32 %v869_v27, 0.0 }
 0x147   : > { %v884_v30 = vmax.f32 %v868_v29, 0.0  ;;  %v1543_v31 = vpop.f32.mrb[12].mxu0 }
 0x148   : > { %v871_v33 = vadd.f32 %v1543_v31, %v1422_v59  ;;  %v832_v34 = vpop.f32.mrb[13].mxu0 }
 0x149   : > { %v870_v35 = vadd.f32 %v1422_v59, %v832_v34  ;;  %1594 = vmatprep.mubr.f32.mxu1 %v884_v30 }
 0x14a   : > { %1595 = vmatmul.mubr.f32.gmra.mrb[10].mxu1 %v885_v32  ;;  %v887_v38 = vmax.f32 %v871_v33, 0.0 }
 0x14b   : > { %v886_v36 = vmax.f32 %v870_v35, 0.0  ;;  %v1546_v37 = vpop.f32.mrb[14].mxu0 }
 0x14c   : > { %v873_v39 = vadd.f32 %v1546_v37, %v1422_v59  ;;  %v842_v40 = vpop.f32.mrb[15].mxu0 }
 0x14d   : > { %v872_v41 = vadd.f32 %v1422_v59, %v842_v40  ;;  %1597 = vmatprep.mubr.f32.mxu1 %v886_v36  ;;  %v2228_v59 = vld [vmem:[%s2051_s23 + $0x68] sm:$0xff] }
 0x14e   : > { %1598 = vmatmul.mubr.f32.gmra.mrb[12].mxu1 %v887_v38  ;;  %v889_v43 = vmax.f32 %v873_v39, 0.0 }
 0x14f   : > { %v888_v42 = vmax.f32 %v872_v41, 0.0 }
 0x151   : > { %1600 = vmatprep.mubr.f32.mxu1 %v888_v42 }
 0x152   : > { %1601 = vmatmul.mubr.f32.gmra.mrb[14].mxu1 %v889_v43 }
 0x209   : > { %v1581_v0 = vpop.f32.mrb[0].mxu1 }
 0x20a   : > { %v2240_v1 = vadd.f32 %v1581_v0, %v1423_v63  ;;  %v979_v2 = vpop.f32.mrb[1].mxu1 }
 0x20b   : > { %v2242_v3 = vadd.f32 %v1423_v63, %v979_v2 }
 0x20d   : > { %v1584_v6 = vpop.f32.mrb[2].mxu1 }
 0x20e   : > { %v2246_v7 = vadd.f32 %v1584_v6, %v1423_v63  ;;  %v989_v8 = vpop.f32.mrb[3].mxu1 }
 0x20f   : > { %v2248_v9 = vadd.f32 %v1423_v63, %v989_v8  ;;  %v2462_v8 = vmov %v1102_v62 }
 0x211   : > { %v1587_v12 = vpop.f32.mrb[4].mxu1 }
 0x212   : > { %v2252_v13 = vadd.f32 %v1587_v12, %v1423_v63  ;;  %v999_v14 = vpop.f32.mrb[5].mxu1 }
 0x213   : > { %v2254_v15 = vadd.f32 %v1423_v63, %v999_v14 }
 0x215   : > { %v1590_v18 = vpop.f32.mrb[6].mxu1 }
 0x216   : > { %v2258_v19 = vadd.f32 %v1590_v18, %v1423_v63  ;;  %v1009_v20 = vpop.f32.mrb[7].mxu1 }
 0x217   : > { %v2260_v21 = vadd.f32 %v1423_v63, %v1009_v20 }
 0x219   : > { %v1593_v24 = vpop.f32.mrb[8].mxu1 }
 0x21a   : > { %v2264_v25 = vadd.f32 %v1593_v24, %v1423_v63  ;;  %v1019_v26 = vpop.f32.mrb[9].mxu1 }
 0x21b   : > { %v2266_v27 = vadd.f32 %v1423_v63, %v1019_v26 }
 0x21d   : > { %v1596_v30 = vpop.f32.mrb[10].mxu1 }
 0x21e   : > { %v2270_v31 = vadd.f32 %v1596_v30, %v1423_v63  ;;  %v1029_v32 = vpop.f32.mrb[11].mxu1 }
 0x21f   : > { %v2272_v33 = vadd.f32 %v1423_v63, %v1029_v32 }
 0x221   : > { %v1068_v35 = vmax.f32 %v2272_v33, 0.0  ;;  %v1599_v36 = vpop.f32.mrb[12].mxu1  ;;  %1317 = sbr.rel (%p1315_p10) target bundleno = 735 (0x2df), region = 98 }
 0x222   : > { %v2276_v37 = vadd.f32 %v1599_v36, %v1423_v63  ;;  %v1039_v38 = vpop.f32.mrb[13].mxu1 }
 0x223   : > { %v2278_v39 = vadd.f32 %v1423_v63, %v1039_v38 }
 0x224   : > { %v1071_v40 = vmax.f32 %v2276_v37, 0.0 }
 0x225   : > { %v1070_v41 = vmax.f32 %v2278_v39, 0.0  ;;  %v1602_v42 = vpop.f32.mrb[14].mxu1 }
 0x226   : > { %v2282_v43 = vadd.f32 %v1602_v42, %v1423_v63  ;;  %v1049_v44 = vpop.f32.mrb[15].mxu1 }
 0x227   : > { %v2284_v0 = vadd.f32 %v1423_v63, %v1049_v44 }
 0x228 LB: >> { %v1901_v63 = vmov 0   ;;  %v2305_v12 = vstv %s1892_s24  ;;  %v2463_v16 = vmax.f32 %v2252_v13, 0.0  ;;  %v2464_v17 = vmax.f32 %v2254_v15, 0.0  ;;  %s1106_s24 = sadd.s32 1, %s1892_s24   ;;  %s1892_s24 = sphi %s2194_s24, %s1106_s24   ;;  %v1888_v62 = vphi %v1102_v62, %v2476_v62  }
 0x229   : >> { %1751 = vset.pattern.permute.xlu1 %v1901_v63  ;;  %1750 = vset.pattern.permute.xlu0 %v1901_v63  ;;  %vm1113_vm4 = vcmp.eq.s32.totalorder %v2190_v47, %v2305_v12  ;;  %vm1111_vm5 = vcmp.eq.s32.totalorder %v2184_v45, %v2305_v12  ;;  %vm1114_vm6 = vcmp.eq.s32.totalorder %v2198_v49, %v2305_v12  ;;  %v2465_v11 = vmax.f32 %v2248_v9, 0.0  ;;  %p1105_p11 = scmp.ge.s32.totalorder %s1106_s24, %s1101_s27 }
 0x22a   : >> { %vm1112_vm7 = vcmp.eq.s32.totalorder %v2187_v46, %v2305_v12  ;;  %v1129_v14 = vsel %vm1113_vm4, 1, %v1901_v63  ;;  %v1127_v18 = vsel %vm1111_vm5, 1, %v1901_v63  ;;  %v1130_v20 = vsel %vm1114_vm6, 1, %v1901_v63 }
 0x22b   : >> { %1150 = vperm.xlu1 %1751, %v1129_v14   ;;  %1144 = vperm.xlu0 %1750, %v1127_v18   ;;  %v1128_v24 = vsel %vm1112_vm7, 1, %v1901_v63  ;;  %vm1116_vm8 = vcmp.eq.s32.totalorder %v2204_v51, %v2305_v12  ;;  %vm1115_vm9 = vcmp.eq.s32.totalorder %v2201_v50, %v2305_v12  ;;  %vm1118_vm10 = vcmp.eq.s32.totalorder %v2210_v53, %v2305_v12 }
 0x22c   : >> { %v1132_v26 = vsel %vm1116_vm8, 1, %v1901_v63  ;;  %v1131_v30 = vsel %vm1115_vm9, 1, %v1901_v63  ;;  %vm1117_vm11 = vcmp.eq.s32.totalorder %v2207_v52, %v2305_v12  ;;  %v1134_v32 = vsel %vm1118_vm10, 1, %v1901_v63 }
 0x22d   : >> { %v1133_v36 = vsel %vm1117_vm11, 1, %v1901_v63  ;;  %vm1120_vm12 = vcmp.eq.s32.totalorder %v2216_v55, %v2305_v12  ;;  %vm1119_vm13 = vcmp.eq.s32.totalorder %v2213_v54, %v2305_v12  ;;  %vm1122_vm14 = vcmp.eq.s32.totalorder %v2222_v57, %v2305_v12 }
 0x22e   : >> { %v1136_v38 = vsel %vm1120_vm12, 1, %v1901_v63  ;;  %v1135_v42 = vsel %vm1119_vm13, 1, %v1901_v63  ;;  %vm1121_vm15 = vcmp.eq.s32.totalorder %v2219_v56, %v2305_v12  ;;  %v1138_v44 = vsel %vm1122_vm14, 1, %v1901_v63 }
 0x22f   : >> { %1153 = vperm.xlu1 %1751, %v1130_v20   ;;  %1147 = vperm.xlu0 %1750, %v1128_v24   ;;  %v1137_v8 = vsel %vm1121_vm15, 1, %v1901_v63  ;;  %vm1124_vm0 = vcmp.eq.s32.totalorder %v2228_v59, %v2305_v12  ;;  %vm1123_vm1 = vcmp.eq.s32.totalorder %v2225_v58, %v2305_v12  ;;  %vm1126_vm2 = vcmp.eq.s32.totalorder %v2234_v61, %v2305_v12 }
 0x230   : >> { %v1140_v14 = vsel %vm1124_vm0, 1, %v1901_v63  ;;  %v1139_v18 = vsel %vm1123_vm1, 1, %v1901_v63  ;;  %vm1125_vm3 = vcmp.eq.s32.totalorder %v2231_v60, %v2305_v12  ;;  %v1142_v20 = vsel %vm1126_vm2, 1, %v1901_v63 }
 0x231   : >> { %v1141_v24 = vsel %vm1125_vm3, 1, %v1901_v63  ;;  %v2466_v5 = vmax.f32 %v2242_v3, 0.0  ;;  %v2467_v10 = vmax.f32 %v2246_v7, 0.0  ;;  %v2468_v4 = vmax.f32 %v2240_v1, 0.0 }
 0x232   : >> { %v2469_v22 = vmax.f32 %v2258_v19, 0.0  ;;  %v2470_v23 = vmax.f32 %v2260_v21, 0.0  ;;  %v2471_v28 = vmax.f32 %v2264_v25, 0.0  ;;  %v2472_v29 = vmax.f32 %v2266_v27, 0.0 }
 0x233   : >> { %1159 = vperm.xlu1 %1751, %v1132_v26   ;;  %1156 = vperm.xlu0 %1750, %v1131_v30   ;;  %v2473_v34 = vmax.f32 %v2270_v31, 0.0 }
 0x237   : >> { %1165 = vperm.xlu1 %1751, %v1134_v32   ;;  %1162 = vperm.xlu0 %1750, %v1133_v36  }
 0x23b   : >> { %1171 = vperm.xlu1 %1751, %v1136_v38   ;;  %1168 = vperm.xlu0 %1750, %v1135_v42  }
 0x23f   : >> { %1177 = vperm.xlu1 %1751, %v1138_v44   ;;  %1174 = vperm.xlu0 %1750, %v1137_v8  }
 0x243   : >> { %1183 = vperm.xlu1 %1751, %v1140_v14   ;;  %1180 = vperm.xlu0 %1750, %v1139_v18  }
 0x247   : >> { %1189 = vperm.xlu1 %1751, %v1142_v20   ;;  %1186 = vperm.xlu0 %1750, %v1141_v24  }
 0x2aa   : >> { %v1151_v26 = vpop.permute.xlu1 %1150  ;;  %v1145_v30 = vpop.permute.xlu0 %1144 }
 0x2ab   : >> { %vm1193_vm6 = vcmp.eq.s32.totalorder %v1151_v26, 1  ;;  %vm1191_vm7 = vcmp.eq.s32.totalorder %v1145_v30, 1 }
 0x2ac   : >> { %v1209_v24 = vsel %vm1193_vm6, %v2465_v11, -inf  ;;  %v1207_v26 = vsel %vm1191_vm7, %v2466_v5, -inf }
 0x2ae   : >> { %v1154_v32 = vpop.permute.xlu1 %1153  ;;  %v1148_v36 = vpop.permute.xlu0 %1147 }
 0x2af   : >> { %vm1194_vm8 = vcmp.eq.s32.totalorder %v1154_v32, 1  ;;  %vm1192_vm9 = vcmp.eq.s32.totalorder %v1148_v36, 1 }
 0x2b0   : >> { %v1210_v30 = vsel %vm1194_vm8, %v2467_v10, -inf  ;;  %v1208_v32 = vsel %vm1192_vm9, %v2468_v4, -inf }
 0x2b2   : >> { %v1160_v38 = vpop.permute.xlu1 %1159  ;;  %v1157_v42 = vpop.permute.xlu0 %1156 }
 0x2b3   : >> { %vm1196_vm4 = vcmp.eq.s32.totalorder %v1160_v38, 1  ;;  %vm1195_vm5 = vcmp.eq.s32.totalorder %v1157_v42, 1 }
 0x2b4   : >> { %v1212_v18 = vsel %vm1196_vm4, %v2463_v16, -inf  ;;  %v1211_v20 = vsel %vm1195_vm5, %v2464_v17, -inf  ;;  %vm1244_vm4 = vcmp.eq.s32.totalorder %v2192_v48, %v2305_v12 }
 0x2b5   : >> { %v1223_v38 = vmax.f32 %v1207_v26, %v1211_v20 }
 0x2b6   : >> { %v1166_v44 = vpop.permute.xlu1 %1165  ;;  %v1163_v8 = vpop.permute.xlu0 %1162 }
 0x2b7   : >> { %vm1198_vm10 = vcmp.eq.s32.totalorder %v1166_v44, 1  ;;  %vm1197_vm11 = vcmp.eq.s32.totalorder %v1163_v8, 1 }
 0x2b8   : >> { %v1214_v36 = vsel %vm1198_vm10, %v2469_v22, -inf }
 0x2b9   : >> { %v1226_v5 = vmax.f32 %v1210_v30, %v1214_v36 }
 0x2ba   : >> { %v1172_v6 = vpop.permute.xlu1 %1171  ;;  %v1169_v2 = vpop.permute.xlu0 %1168 }
 0x2bb   : >> { %vm1200_vm12 = vcmp.eq.s32.totalorder %v1172_v6, 1  ;;  %vm1199_vm13 = vcmp.eq.s32.totalorder %v1169_v2, 1  ;;  %v1213_v2 = vsel %vm1197_vm11, %v2470_v23, -inf  ;;  %v1224_v6 = vmax.f32 %v1208_v32, %v1212_v18 }
 0x2bc   : >> { %v1216_v42 = vsel %vm1200_vm12, %v2471_v28, -inf  ;;  %v1215_v44 = vsel %vm1199_vm13, %v2472_v29, -inf  ;;  %v1225_v10 = vmax.f32 %v1209_v24, %v1213_v2  ;;  %v2475_v24 = vmax.f32 %v2284_v0, 0.0 }
 0x2bd   : >> { %v1228_v26 = vmax.f32 %v1224_v6, %v1216_v42  ;;  %v1227_v32 = vmax.f32 %v1223_v38, %v1215_v44 }
 0x2be   : >> { %v1178_v63 = vpop.permute.xlu1 %1177  ;;  %v1175_v14 = vpop.permute.xlu0 %1174 }
 0x2bf   : >> { %vm1202_vm14 = vcmp.eq.s32.totalorder %v1178_v63, 1  ;;  %vm1201_vm15 = vcmp.eq.s32.totalorder %v1175_v14, 1 }
 0x2c0   : >> { %v1218_v14 = vsel %vm1202_vm14, %v2473_v34, -inf  ;;  %v1217_v4 = vsel %vm1201_vm15, %v1068_v35, -inf }
 0x2c1   : >> { %v1230_v11 = vmax.f32 %v1226_v5, %v1218_v14  ;;  %v1229_v16 = vmax.f32 %v1225_v10, %v1217_v4 }
 0x2c2   : >> { %v1184_v8 = vpop.permute.xlu1 %1183  ;;  %v1181_v63 = vpop.permute.xlu0 %1180 }
 0x2c3   : >> { %vm1204_vm0 = vcmp.eq.s32.totalorder %v1184_v8, 1  ;;  %vm1203_vm1 = vcmp.eq.s32.totalorder %v1181_v63, 1  ;;  %v2474_v8 = vmax.f32 %v2282_v43, 0.0 }
 0x2c4   : >> { %v1220_v18 = vsel %vm1204_vm0, %v1071_v40, -inf  ;;  %v1219_v20 = vsel %vm1203_vm1, %v1070_v41, -inf }
 0x2c5   : >> { %v1232_v23 = vmax.f32 %v1228_v26, %v1220_v18  ;;  %v1231_v28 = vmax.f32 %v1227_v32, %v1219_v20 }
 0x2c6   : >> { %v1190_v17 = vpop.permute.xlu1 %1189  ;;  %v1187_v22 = vpop.permute.xlu0 %1186 }
 0x2c7   : >> { %vm1206_vm2 = vcmp.eq.s32.totalorder %v1190_v17, 1  ;;  %vm1205_vm3 = vcmp.eq.s32.totalorder %v1187_v22, 1  ;;  %v1235_v29 = vmax.f32 %v1231_v28, %v1232_v23 }
 0x2c8   : >> { %v1222_v30 = vsel %vm1206_vm2, %v2474_v8, -inf  ;;  %v1221_v36 = vsel %vm1205_vm3, %v2475_v24, -inf }
 0x2c9   : >> { %v1234_v2 = vmax.f32 %v1230_v11, %v1222_v30  ;;  %v1233_v63 = vmax.f32 %v1229_v16, %v1221_v36 }
 0x2cb   : >> { %v1236_v34 = vmax.f32 %v1233_v63, %v1234_v2 }
 0x2cd   : >> { %v1237_v6 = vmax.f32 %v1235_v29, %v1236_v34 }
 0x2cf   : >> { %v1238_v38 = vrot.slane %v1237_v6, 4 }
 0x2d1   : >> { %v1239_v5 = vmax.f32 %v1237_v6, %v1238_v38 }
 0x2d3   : >> { %v1240_v4 = vrot.slane %v1239_v5, 2 }
 0x2d5   : >> { %v1241_v10 = vmax.f32 %v1239_v5, %v1240_v4 }
 0x2d7   : >> { %v1242_v42 = vrot.slane %v1241_v10, 1 }
 0x2d8   : > { %1108 = sbr.rel (!%p1105_p11) target bundleno = 552 (0x228), region = 104 }
 0x2d9   : >> { %v1243_v17 = vmax.f32 %v1241_v10, %v1242_v42 }
 0x2db   : >> { %v1247_v22 = vsel %vm1244_vm4, %v1243_v17, -inf }
 0x2dc   : >> { %v1248_v44 = vmax.f32 %v1888_v62, %v1247_v22  }
 0x2de   : >> { %v2476_v62 = vmov %v1248_v44  ;;  %v2477_v8 = vmov (%p1105_p11), %v1248_v44 }
 0x2df PF: > { %1249 = vst [vmem:[%s2053_s19] sm:$0xff] %v1896_v8  ;;  %s1426_s23 = sshll.u32 %s1872_s25, 7  ;;  %s1264_s15 = sshll.u32 %s2053_s19, 4  ;;  %v1896_v8 = vphi %v2462_v8, %v2477_v8   ;;  %s1265_s15 = int_to_ptr.vmem [resolvable:$true] %s1264_s15 }
 0x2e0   : > { %s2389_s0 = scalar_lea.hbm %s2448_s10, %s1426_s23  ;;  %s1251_s29 = scalar_lea.sflag [#allocation6], %s383_s18 }
 0x2e1   : > { %s1776_s30 = scalar_lea.vmem %s1265_s15, 128  ;;  %s1902_s16 = smov [#allocation5]  }
 0x2e2   : > { %p1777_p12 = scmp.ne.s32.totalorder %s1265_s15, %s1776_s30  ;;  %s1780_s12 = sshll.u32 %s1902_s16, 4  ;;  %s1781_s12 = int_to_ptr.vmem [resolvable:$false] %s1780_s12 }
 0x2e3   : > { %s1782_s21 = scalar_lea.vmem %s1781_s12, 256  ;;  %p1783_p2 = scmp.lt.s32.totalorder %s1265_s15, %s1781_s12 }
 0x2e4   : > { %p1778_p0 = pnand %p1777_p12, %p2013_p13  ;;  %p1784_p3 = scmp.lt.s32.totalorder %s1782_s21, %s1776_s30 }
 0x2e6   : > { %p1779_p1 = pneg %p1778_p0  ;;  %p1785_p4 = por %p1784_p3, %p1783_p2 }
 0x2e8   : > { %p1786_p6 = pnand %p1785_p4, %p1779_p1 }
 0x2ea   : > { %1789 = shalt.err (!%p1786_p6)
}
 0x2eb   : > { %s1790_s25 = scalar_lea.hbm %s2389_s0, 128  ;;  %s1794_s24 = scalar_lea.hbm %s2448_s10, 256 }
 0x2ec   : > { %p1791_p7 = scmp.ne.s32.totalorder %s2389_s0, %s1790_s25  ;;  %p1795_p10 = scmp.lt.u32.totalorder %s2389_s0, %s2448_s10 }
 0x2ed   : > { %p1796_p11 = scmp.lt.u32.totalorder %s1794_s24, %s1790_s25  ;;  %p1798_p0 = scmp.lt.u32.totalorder %s1790_s25, %s2389_s0 }
 0x2ee   : > { %p1792_p8 = pnand %p1791_p7, %p2013_p13 }
 0x2ef   : > { %p1797_p12 = por %p1796_p11, %p1795_p10 }
 0x2f0   : > { %p1793_p9 = pneg %p1792_p8 }
 0x2f1   : > { %p1799_p1 = por %p1798_p0, %p1797_p12 }
 0x2f3   : > { %p1800_p2 = pnand %p1799_p1, %p1793_p9 }
 0x2f5   : > { %1803 = shalt.err (!%p1800_p2)
}
 0x2f6   : > { %1651 = dma.vmem_to_hbm [thread:$0]  (%p2013_p13), %s1265_s15, 128, %s2389_s0, %s1251_s29  }
 0x2f7 PF: > { %p1657_p3 = scmp.ge.s32.totalorder %s1884_s28, 2  ;;  %s1276_s11 = sand.u32 1, %s1856_s1  }
 0x2f8   : > { %s1277_s23 = scalar_lea.sflag [#allocation6], %s1276_s11 }
 0x2f9   : > { %p1654_p4 = pnand %p1657_p3, %p2023_p5 }
 0x2fb   : > { %1851 = dma.done.wait (!%p1654_p4), %s1277_s23, 128  }
 0x2fc   : > { %1853 = vsyncadd (!%p1654_p4), %s1277_s23, 4294967168  ;;  %s33_s28 = sadd.s32 1, %s1884_s28   ;;  %s2478_s17 = sld [smem:[#allocation9_spill]] }
 0x2fd   : > { %p30_p6 = scmp.ge.s32.totalorder %s33_s28, 6   ;;  %s2479_s23 = sld [smem:[#allocation14_spill]] }
 0x2fe   : > { %s2480_s24 = sld [smem:[#allocation10_spill]]  ;;  %s2481_s25 = sld [smem:[#allocation11_spill]] }
 0x2ff   : > { %s2482_s26 = sld [smem:[#allocation12_spill]]  ;;  %s2483_s27 = sld [smem:[#allocation13_spill]] }
 0x300   : > { %s2484_s1 = smov %s1860_s22  ;;  %32 = sbr.rel (!%p30_p6) target bundleno = 30 (0x1e), region = 115 }
 0x302   : > { %s2485_s22 = smov %s2478_s17 }
 0x307   :  { %1282 = vsyncpa [#allocation6], 1 }
 0x308   :  { %1284 = vsyncpa [#allocation6 + $0x1], 1 }

</bundles_post_ra>
